<compile_context>
chip_gen: v7x
topology: tpu7x:2x2x1
jax: 0.10.0
libtpu: 0.0.40
codegen_flags: <defaults>
</compile_context>

<pallas_src>
import functools
import math

import jax
import jax.numpy as jnp
from jax.experimental import pallas as pl
from jax.experimental.pallas import tpu as pltpu


KERNEL_SIZE = 5
PAD = (KERNEL_SIZE - 1) // 2  # padding=True -> 2


def _round_up(x, m):
    return (x + m - 1) // m * m


def _gaussian_weights_1d(kernel_size=KERNEL_SIZE):
    """1D weights whose outer product equals GaussianFilter's normalized 5x5 kernel."""
    mean = (kernel_size - 1) / 2.0
    var = (kernel_size / 6.0) ** 2
    e = [math.exp(-((i - mean) ** 2) / (2.0 * var)) for i in range(kernel_size)]
    s = sum(e)
    return tuple(w / s for w in e)


def _sep5(x2, axis, weights):
    """Symmetric 5-tap filter along `axis` of a 2D f32 slab using pltpu.roll.

    Boundary handling relies on the slab having >= PAD zero rows/cols at the
    high end of each plane (so cyclic wrap-around only brings in zeros);
    because the +d and -d taps carry the same weight, no masks are needed and
    the roll direction convention is irrelevant.
    """
    n = x2.shape[axis]
    if weights is None:  # box filter: plain sum, caller scales by 1/25 once
        acc = x2
        for d in (1, 2):
            acc = acc + pltpu.roll(x2, shift=d, axis=axis)
            acc = acc + pltpu.roll(x2, shift=(n - d) % n, axis=axis)
        return acc
    acc = x2 * weights[PAD]
    for d in (1, 2):
        pair = (pltpu.roll(x2, shift=d, axis=axis)
                + pltpu.roll(x2, shift=(n - d) % n, axis=axis))
        acc = acc + pair * weights[PAD + d]  # symmetric: w[PAD+d] == w[PAD-d]
    return acc


def _filter_low_kernel(x_ref, o_ref, pad_ref, *, recursions, weights, inv_norm):
    """x_ref/o_ref: (TB, H, W) blocks.  pad_ref: (TB, Hp, Wp) f32 VMEM scratch."""
    TB, H, W = o_ref.shape
    _, Hp, Wp = pad_ref.shape

    # Zero only the padding frame (bottom row strip, right column strip); the
    # interior is fully overwritten by the raw planes right below.  Re-zeroing
    # every step keeps this correct under any megacore grid split.
    pad_ref[:, H:, :] = jnp.zeros((TB, Hp - H, Wp), jnp.float32)
    pad_ref[:, :H, W:] = jnp.zeros((TB, H, Wp - W), jnp.float32)
    pad_ref[:, :H, :W] = x_ref[...].astype(jnp.float32)

    for r in range(recursions):
        x2 = pad_ref[...].reshape(TB * Hp, Wp)
        h = _sep5(x2, axis=1, weights=weights)   # along W (lanes)
        v = _sep5(h, axis=0, weights=weights)    # along H (sublanes)
        res = v.reshape(TB, Hp, Wp)[:, :H, :W]
        if inv_norm != 1.0:
            res = res * inv_norm
        if r == recursions - 1:
            o_ref[...] = res.astype(o_ref.dtype)
        else:
            pad_ref[:, :H, :W] = res             # padding frame stays zero


def _choose_tb(bc, h, w, hp, wp, itemsize, budget_bytes=8 * 1024 * 1024):
    """Largest plane batch TB that divides N*C, fits a conservative VMEM budget
    (safe under v5e's 16 MiB scoped default), and keeps the grid >= 2 for the
    two v7x TensorCores."""
    per_plane = 4 * h * w * itemsize + hp * wp * 4  # 2x dbl-buffered in/out + f32 slab
    divisors = [t for t in range(1, bc + 1) if bc % t == 0]
    fits = [t for t in divisors if t * per_plane <= budget_bytes]
    if not fits:
        # TODO(synk): H-tile with a 2-row halo when a single full plane overflows
        # the VMEM budget (needed for very large planes, esp. v7x 64 MiB VMEM).
        return 1
    multi = [t for t in fits if bc // t >= 2]
    return max(multi) if multi else max(fits)


def filter_low(img, recursions=1, gaussian=False):
    """Pallas equivalent of FilterLow.forward (kernel_size=5, stride=1,
    padding=True, include_pad=True)."""
    if recursions <= 0:
        return img
    N, C, H, W = img.shape
    BC = N * C
    x = img.reshape(BC, H, W)

    Hp = _round_up(H + PAD, 8)     # >= PAD zero rows below each plane in the slab
    Wp = _round_up(W + PAD, 128)   # lane-dense slab with >= PAD zero cols at right
    TB = _choose_tb(BC, H, W, Hp, Wp, img.dtype.itemsize)

    weights = _gaussian_weights_1d() if gaussian else None
    inv_norm = 1.0 if gaussian else 1.0 / float(KERNEL_SIZE * KERNEL_SIZE)

    kernel = functools.partial(_filter_low_kernel, recursions=recursions,
                               weights=weights, inv_norm=inv_norm)
    out = pl.pallas_call(
        kernel,
        out_shape=jax.ShapeDtypeStruct((BC, H, W), img.dtype),
        grid_spec=pltpu.PrefetchScalarGridSpec(
            num_scalar_prefetch=0,
            grid=(BC // TB,),
            in_specs=[pl.BlockSpec((TB, H, W), lambda i: (i, 0, 0))],
            out_specs=pl.BlockSpec((TB, H, W), lambda i: (i, 0, 0)),
            scratch_shapes=[pltpu.VMEM((TB, Hp, Wp), jnp.float32)],
        ),
        compiler_params=pltpu.CompilerParams(
            dimension_semantics=("parallel",)),
        cost_estimate=pl.CostEstimate(
            flops=int(10 * recursions * BC * H * W),
            transcendentals=0,
            bytes_accessed=int(2 * BC * H * W * img.dtype.itemsize)),
    )(x)
    return out.reshape(N, C, H, W)


def _reference_filter_low(img, recursions=1):
    """Pure-JAX reference: AvgPool2d(5, stride=1, pad=2, count_include_pad=True)."""
    N, C, H, W = img.shape
    for _ in range(recursions):
        xp = jnp.pad(img, ((0, 0), (0, 0), (PAD, PAD), (PAD, PAD)))
        acc = jnp.zeros_like(img)
        for dy in range(KERNEL_SIZE):
            for dx in range(KERNEL_SIZE):
                acc = acc + xp[:, :, dy:dy + H, dx:dx + W]
        img = acc / (KERNEL_SIZE * KERNEL_SIZE)
    return img


def _reference_gaussian(img, recursions=1):
    """Pure-JAX reference: depthwise 5x5 Gaussian conv, zero padding=2."""
    N, C, H, W = img.shape
    w = jnp.array(_gaussian_weights_1d(), jnp.float32)
    k2 = jnp.outer(w, w)
    for _ in range(recursions):
        xp = jnp.pad(img, ((0, 0), (0, 0), (PAD, PAD), (PAD, PAD)))
        acc = jnp.zeros_like(img)
        for dy in range(KERNEL_SIZE):
            for dx in range(KERNEL_SIZE):
                acc = acc + k2[dy, dx] * xp[:, :, dy:dy + H, dx:dx + W]
        img = acc
    return img


if __name__ == "__main__":
    key = jax.random.PRNGKey(0)
    N, C, H, W = 2, 3, 16, 16  # RGB images, as FilterLow is used on
    img = jax.random.normal(key, (N, C, H, W), dtype=jnp.float32)

    # Default config: recursions=1, box (average) filter.
    out = jax.block_until_ready(filter_low(img))
    ref = _reference_filter_low(img, recursions=1)
    assert out.shape == (N, C, H, W)
    assert jnp.allclose(out, ref, atol=1e-5, rtol=1e-5)

    # recursions=2, fused in-kernel.
    out2 = jax.block_until_ready(filter_low(img, recursions=2))
    ref2 = _reference_filter_low(img, recursions=2)
    assert jnp.allclose(out2, ref2, atol=1e-5, rtol=1e-5)

    # gaussian=True path (depthwise 5x5 Gaussian conv, same padding).
    outg = jax.block_until_ready(filter_low(img, recursions=1, gaussian=True))
    refg = _reference_gaussian(img, recursions=1)
    assert jnp.allclose(outg, refg, atol=1e-5, rtol=1e-5)

    print("KERNEL_OK")
</pallas_src>

<mosaic_0001>
module attributes {stable_mosaic.version = 11 : i64} {
  func.func @_filter_low_kernel(%arg0: i32, %arg1: memref<3x16x16xf32, #tpu.memory_space<vmem>>, %arg2: memref<3x16x16xf32, #tpu.memory_space<vmem>>, %arg3: memref<3x24x128xf32, #tpu.memory_space<vmem>>) attributes {dimension_semantics = [#tpu.dimension_semantics<parallel>], iteration_bounds = array<i64: 2>, scalar_prefetch = 0 : i64, scratch_operands = 1 : i64, tpu.core_type = #tpu.core_type<tc>, window_params = [{transform_indices = @transform_0, window_bounds = array<i64: 3, 16, 16>}, {transform_indices = @transform_1, window_bounds = array<i64: 3, 16, 16>}]} {
    %cst = arith.constant 0.000000e+00 : f32
    %0 = vector.broadcast %cst : f32 to vector<3x8x128xf32>
    %c0 = arith.constant 0 : index
    %c16 = arith.constant 16 : index
    %c0_0 = arith.constant 0 : index
    %1 = vector.load %arg3[%c0, %c16, %c0_0] : memref<3x24x128xf32, #tpu.memory_space<vmem>>, vector<3x8x128xf32>
    tpu.vector_store %arg3[%c0, %c16, %c0_0], %0 {strides = array<i32>} : memref<3x24x128xf32, #tpu.memory_space<vmem>>, vector<3x8x128xf32>,
    %cst_1 = arith.constant 0.000000e+00 : f32
    %2 = vector.broadcast %cst_1 : f32 to vector<3x16x112xf32>
    %c0_2 = arith.constant 0 : index
    %c0_3 = arith.constant 0 : index
    %c16_4 = arith.constant 16 : index
    %3 = vector.load %arg3[%c0_2, %c0_3, %c16_4] : memref<3x24x128xf32, #tpu.memory_space<vmem>>, vector<3x16x112xf32>
    tpu.vector_store %arg3[%c0_2, %c0_3, %c16_4], %2 {strides = array<i32>} : memref<3x24x128xf32, #tpu.memory_space<vmem>>, vector<3x16x112xf32>,
    %c0_5 = arith.constant 0 : index
    %c0_6 = arith.constant 0 : index
    %c0_7 = arith.constant 0 : index
    %4 = vector.load %arg1[%c0_5, %c0_6, %c0_7] : memref<3x16x16xf32, #tpu.memory_space<vmem>>, vector<3x16x16xf32>
    %c0_8 = arith.constant 0 : index
    %c0_9 = arith.constant 0 : index
    %c0_10 = arith.constant 0 : index
    %5 = vector.load %arg3[%c0_8, %c0_9, %c0_10] : memref<3x24x128xf32, #tpu.memory_space<vmem>>, vector<3x16x16xf32>
    tpu.vector_store %arg3[%c0_8, %c0_9, %c0_10], %4 {strides = array<i32>} : memref<3x24x128xf32, #tpu.memory_space<vmem>>, vector<3x16x16xf32>,
    %c0_11 = arith.constant 0 : index
    %c0_12 = arith.constant 0 : index
    %c0_13 = arith.constant 0 : index
    %6 = vector.load %arg3[%c0_11, %c0_12, %c0_13] : memref<3x24x128xf32, #tpu.memory_space<vmem>>, vector<3x24x128xf32>
    %7 = vector.shape_cast %6 : vector<3x24x128xf32> to vector<72x128xf32>
    %c1_i32 = arith.constant 1 : i32
    %8 = tpu.dynamic_rotate %7 by %c1_i32 dim 1 : vector<72x128xf32>, i32 -> vector<72x128xf32>
    %9 = arith.addf %7, %8 : vector<72x128xf32>
    %c127_i32 = arith.constant 127 : i32
    %10 = tpu.dynamic_rotate %7 by %c127_i32 dim 1 : vector<72x128xf32>, i32 -> vector<72x128xf32>
    %11 = arith.addf %9, %10 : vector<72x128xf32>
    %c2_i32 = arith.constant 2 : i32
    %12 = tpu.dynamic_rotate %7 by %c2_i32 dim 1 : vector<72x128xf32>, i32 -> vector<72x128xf32>
    %13 = arith.addf %11, %12 : vector<72x128xf32>
    %c126_i32 = arith.constant 126 : i32
    %14 = tpu.dynamic_rotate %7 by %c126_i32 dim 1 : vector<72x128xf32>, i32 -> vector<72x128xf32>
    %15 = arith.addf %13, %14 : vector<72x128xf32>
    %c1_i32_14 = arith.constant 1 : i32
    %16 = tpu.dynamic_rotate %15 by %c1_i32_14 dim 0 : vector<72x128xf32>, i32 -> vector<72x128xf32>
    %17 = arith.addf %15, %16 : vector<72x128xf32>
    %c71_i32 = arith.constant 71 : i32
    %18 = tpu.dynamic_rotate %15 by %c71_i32 dim 0 : vector<72x128xf32>, i32 -> vector<72x128xf32>
    %19 = arith.addf %17, %18 : vector<72x128xf32>
    %c2_i32_15 = arith.constant 2 : i32
    %20 = tpu.dynamic_rotate %15 by %c2_i32_15 dim 0 : vector<72x128xf32>, i32 -> vector<72x128xf32>
    %21 = arith.addf %19, %20 : vector<72x128xf32>
    %c70_i32 = arith.constant 70 : i32
    %22 = tpu.dynamic_rotate %15 by %c70_i32 dim 0 : vector<72x128xf32>, i32 -> vector<72x128xf32>
    %23 = arith.addf %21, %22 : vector<72x128xf32>
    %24 = vector.shape_cast %23 : vector<72x128xf32> to vector<3x24x128xf32>
    %25 = vector.extract_strided_slice %24 {offsets = [0, 0, 0], sizes = [3, 16, 16], strides = [1, 1, 1]} : vector<3x24x128xf32> to vector<3x16x16xf32>
    %cst_16 = arith.constant 4.000000e-02 : f32
    %26 = vector.broadcast %cst_16 : f32 to vector<3x16x16xf32>
    %27 = arith.mulf %25, %26 : vector<3x16x16xf32>
    %c0_17 = arith.constant 0 : index
    %c0_18 = arith.constant 0 : index
    %c0_19 = arith.constant 0 : index
    %28 = vector.load %arg2[%c0_17, %c0_18, %c0_19] : memref<3x16x16xf32, #tpu.memory_space<vmem>>, vector<3x16x16xf32>
    tpu.vector_store %arg2[%c0_17, %c0_18, %c0_19], %27 {strides = array<i32>} : memref<3x16x16xf32, #tpu.memory_space<vmem>>, vector<3x16x16xf32>,
    return
  }
  func.func @transform_0(%arg0: i32) -> (i32, i32, i32) {
    %c0_i32 = arith.constant 0 : i32
    %c0_i32_0 = arith.constant 0 : i32
    %c0_i32_1 = arith.constant 0 : i32
    return %arg0, %c0_i32, %c0_i32_0 : i32, i32, i32
  }
  func.func @transform_1(%arg0: i32) -> (i32, i32, i32) {
    %c0_i32 = arith.constant 0 : i32
    %c0_i32_0 = arith.constant 0 : i32
    %c0_i32_1 = arith.constant 0 : i32
    return %arg0, %c0_i32, %c0_i32_0 : i32, i32, i32
  }
}

</mosaic_0001>

<bundles_post_ra>
// kernel: tpu_custom_call.1
= control target key start
LH: loop header
LB: loop body
LE: loop exit
PB: predicated region body
PF: predicated region fallthrough
CT: control target
= control target key end

     0   :  { %6 = vsyncpa [#allocation4], 0  ;;  %s1002_s0 = inlined_call_operand.hbm [shape: f32[6,16,16], index: 0, kind: input, shape index: {}]   ;;  %s1003_s1 = inlined_call_operand.hbm [shape: f32[6,16,16], index: 1, kind: output, shape index: {}]  }
   0x1   :  { %8 = vsyncpa [#allocation4 + $0x1], 0 }
   0x2   :  { %9 = vsyncpa [#allocation5], 0 }
   0x3   :  { %11 = vsyncpa [#allocation5 + $0x1], 0  ;;  %s660_s6 = smov 0   ;;  %s662_s7 = smov 0  }
   0x4   :  { %s664_s8 = smov 0   ;;  %s666_s9 = smov 0  }
   0x5 LB: > { %s681_s10 = sadd.s32 4294967295, %s637_s9   ;;  %s468_s11 = sadd.s32 4294967294, %s637_s9   ;;  %s637_s9 = sphi %s666_s9, %s1015_s9   ;;  %s633_s8 = sphi %s664_s8, %s1014_s8   ;;  %s629_s7 = sphi %s662_s7, %s1013_s7   ;;  %s625_s6 = sphi %s660_s6, %s1012_s6  }
   0x6   : > { %s685_s12 = sadd.s32 1, %s637_s9   ;;  %s24_s13 = sadd.s32 1, %s633_s8 }
   0x7   : > { %s21_s14 = ssub.s32 %s637_s9, %s685_s12  ;;  %p31_p0 = scmp.ne.s32.totalorder %s633_s8, %s629_s7 }
   0x8   : > { %p22_p1 = scmp.eq.s32.totalorder %s21_s14, 0  ;;  %p32_p2 = scmp.eq.s32.totalorder %s637_s9, 0 }
   0x9   : > { %p37_p3 = scmp.ne.s32.totalorder %s629_s7, %s625_s6  ;;  %p38_p4 = scmp.eq.s32.totalorder %s681_s10, 0 }
   0xa   : > { %s697_s15 = scalar_select %p22_p1, %s633_s8, %s24_s13  }
   0xb   : > { %p33_p5 = por %p32_p2, %p31_p0  ;;  %p699_p6 = por %p38_p4, %p37_p3 }
   0xc   : > { %p61_p7 = scmp.eq.s32.totalorder %s681_s10, 1  ;;  %p67_p8 = scmp.eq.s32.totalorder %s468_s11, 1 }
   0xd   : > { %p498_p10 = scmp.lt.s32.totalorder %s637_s9, 2  ;;  %s87_s19 = sand.u32 1, %s633_s8  }
   0xe   : > { %p706_p11 = por %p61_p7, %p31_p0  ;;  %p710_p12 = por %p67_p8, %p37_p3 }
   0xf   : > { %s482_s20 = smul.u32 768, %s637_s9  ;;  %p721_p13 = pnand %p498_p10, %p33_p5 }
  0x10   : > { %s1006_s17 = scalar_select %p706_p11, 1, 0 }
  0x11   : > { %s1007_s18 = scalar_select %p710_p12, 1, 0 }
  0x12   : > { %s484_s21 = smul.u32 48, %s87_s19  ;;  %s719_s24 = scalar_lea.hbm %s1002_s0, %s482_s20 }
  0x13   : > { %s727_s28 = scalar_lea.sflag [#allocation4], %s87_s19  ;;  %s541_s29 = scalar_lea.hbm %s719_s24, 768 }
  0x14   : > { %s91_s26 = scalar_lea.vmem [#allocation3], %s484_s21  ;;  %p542_p0 = scmp.ne.s32.totalorder %s719_s24, %s541_s29 }
  0x15   : > { %s99_s27 = sshll.u32 %s91_s26, 4  ;;  %p543_p1 = pneg %p721_p13  ;;  %s725_s27 = int_to_ptr.vmem [resolvable:$true] %s99_s27 }
  0x16   : > { %s546_s3 = scalar_lea.hbm %s1002_s0, 1536  ;;  %p547_p4 = scmp.lt.u32.totalorder %s719_s24, %s1002_s0 }
  0x17   : > { %p544_p2 = pnand %p543_p1, %p542_p0  ;;  %p548_p5 = scmp.lt.u32.totalorder %s546_s3, %s541_s29 }
  0x18   : > { %p550_p8 = scmp.lt.u32.totalorder %s541_s29, %s719_s24 }
  0x19   : > { %p545_p3 = pneg %p544_p2  ;;  %p549_p7 = por %p548_p5, %p547_p4 }
  0x1b   : > { %p551_p10 = por %p550_p8, %p549_p7 }
  0x1d   : > { %p552_p9 = pnand %p551_p10, %p545_p3 }
  0x1f   : > { %555 = shalt.err (!%p552_p9)
}
  0x20   : > { %s556_s11 = scalar_lea.vmem %s725_s27, 768  ;;  %s639_s13 = smov [#allocation3]  }
  0x21   : > { %p557_p0 = scmp.ne.s32.totalorder %s725_s27, %s556_s11  ;;  %s561_s14 = sshll.u32 %s639_s13, 4  ;;  %s562_s14 = int_to_ptr.vmem [resolvable:$false] %s561_s14 }
  0x22   : > { %s563_s19 = scalar_lea.vmem %s562_s14, 1536  ;;  %p564_p11 = scmp.lt.s32.totalorder %s725_s27, %s562_s14 }
  0x23   : > { %p559_p2 = pnand %p557_p0, %p543_p1  ;;  %p565_p4 = scmp.lt.s32.totalorder %s563_s19, %s556_s11 }
  0x25   : > { %p560_p12 = pneg %p559_p2  ;;  %p566_p5 = por %p565_p4, %p564_p11 }
  0x27   : > { %p567_p7 = pnand %p566_p5, %p560_p12 }
  0x29   : > { %570 = shalt.err (!%p567_p7)
}
  0x2a   : > { %s640_s20 = smov 128   ;;  %s641_s21 = smov 8  }
  0x2b   : > { %493 = dma.hbm_to_vmem [thread:$0]  (!%p721_p13), %s719_s24, 768, %s725_s27, %s727_s28, %s640_s20, %s640_s20, %s641_s21  }
  0x2c   : > { %p473_p9 = scmp.ge.s32.totalorder %s637_s9, 1  ;;  %p107_p1 = scmp.lt.s32.totalorder %s637_s9, 3 }
  0x2e   : > { %p108_p3 = pnand %p473_p9, %p107_p1 }
  0x2f   : > { %s758_s22 = sand.u32 (!%p108_p3), 1, %s629_s7  }
  0x30   : > { %111 = sbr.rel (%p108_p3) target bundleno = 279 (0x117), region = 24  ;;  %s114_s26 = scalar_lea.sflag (!%p108_p3), [#allocation4], %s758_s22 }
  0x31   : > { %s485_s23 = smul.u32 (!%p108_p3), 48, %s758_s22 }
  0x33   : > { %s117_s29 = scalar_lea.vmem (!%p108_p3), [#allocation3], %s485_s23 }
  0x37   : > { %616 = dma.done.wait (%p699_p6), %s114_s26, 768  }
  0x38   : > { %618 = vsyncadd (%p699_p6), %s114_s26, 4294966528  ;;  %vm141_vm0 = vcmask 1047680   ;;  %v642_v0 = vmov 0.0   ;;  %s643_s24 = smov 1   ;;  %vm154_vm1 = vcmask 130048   ;;  %v148_v1 = vld [vmem:[%s117_s29] sm:$0xff]  ;;  %v287_v38 = vlaneseq }
  0x39   : > { %174 = vrot.lane.b32.xlu1 %v642_v0, %s643_s24  ;;  %186 = vrot.lane.b32.xlu0 %v642_v0, %s643_s24  ;;  %142 = vst.msk [vmem:[#allocation2] sm:$0xff] %vm141_vm0, %v642_v0  ;;  %143 = vst.msk [vmem:[#allocation2 + $0x8] sm:$0xff] %vm141_vm0, %v642_v0  ;;  %v150_v2 = vld [vmem:[%s117_s29 + $0x10] sm:$0xff]  ;;  %v149_v3 = vld [vmem:[%s117_s29 + $0x8] sm:$0xff]  ;;  %s644_s16 = smov 127   ;;  %s645_s25 = smov 2  }
  0x3a   : > { %144 = vst.msk [vmem:[#allocation2 + $0x18] sm:$0xff] %vm141_vm0, %v642_v0  ;;  %145 = vst.msk [vmem:[#allocation2 + $0x20] sm:$0xff] %vm141_vm0, %v642_v0  ;;  %v153_v4 = vld [vmem:[%s117_s29 + $0x28] sm:$0xff]  ;;  %v151_v5 = vld [vmem:[%s117_s29 + $0x18] sm:$0xff]  ;;  %s646_s27 = smov 126   ;;  %v838_v42 = vshrl.u32 %v287_v38, 7 }
  0x3b   : > { %146 = vst.msk [vmem:[#allocation2 + $0x30] sm:$0xff] %vm141_vm0, %v642_v0  ;;  %147 = vst.msk [vmem:[#allocation2 + $0x38] sm:$0xff] %vm141_vm0, %v642_v0  ;;  %v152_v6 = vld [vmem:[%s117_s29 + $0x20] sm:$0xff]  ;;  %s893_s28 = scalar_lea.vmem [#allocation6], %s485_s23  ;;  %s483_s30 = smul.u32 768, %s681_s10 }
  0x3c   : > { %155 = vst.msk [vmem:[#allocation2] sm:$0xff] %vm154_vm1, %v148_v1  ;;  %157 = vst.msk [vmem:[#allocation2 + $0x18] sm:$0xff] %vm154_vm1, %v150_v2  ;;  %vm289_vm2 = vcmp.lt.s32.totalorder %v838_v42, 1  ;;  %vm311_vm3 = vcmp.lt.s32.totalorder %v838_v42, 7  ;;  %vm333_vm4 = vcmp.lt.s32.totalorder %v838_v42, 2  ;;  %vm355_vm5 = vcmp.lt.s32.totalorder %v838_v42, 6 }
  0x3d   : > { %180 = vrot.lane.b32.xlu1 %v642_v0, %s643_s24  ;;  %156 = vst.msk [vmem:[#allocation2 + $0x8] sm:$0xff] %vm154_vm1, %v149_v3  ;;  %160 = vst.msk [vmem:[#allocation2 + $0x38] sm:$0xff] %vm154_vm1, %v153_v4  ;;  %s395_s2 = sshll.u32 %s893_s28, 4  ;;  %s952_s5 = scalar_lea.hbm %s1003_s1, %s483_s30  ;;  %s954_s2 = int_to_ptr.vmem [resolvable:$true] %s395_s2 }
  0x3e   : > { %158 = vst.msk [vmem:[#allocation2 + $0x20] sm:$0xff] %vm154_vm1, %v151_v5  ;;  %159 = vst.msk [vmem:[#allocation2 + $0x30] sm:$0xff] %vm154_vm1, %v152_v6  ;;  %s381_s10 = scalar_lea.sflag [#allocation5], %s758_s22  ;;  %s571_s11 = scalar_lea.vmem %s954_s2, 768 }
  0x3f   : > { %p572_p6 = scmp.ne.s32.totalorder %s954_s2, %s571_s11  ;;  %p1009_p11 = scmp.ne.s32.totalorder %s1006_s17, 0 }
  0x40   : > { %s647_s13 = smov [#allocation6]  }
  0x41   : > { %p573_p12 = pnand %p572_p6, %p1009_p11  ;;  %s575_s14 = sshll.u32 %s647_s13, 4  ;;  %s576_s14 = int_to_ptr.vmem [resolvable:$false] %s575_s14 }
  0x42   : > { %s577_s19 = scalar_lea.vmem %s576_s14, 1536  ;;  %p578_p8 = scmp.lt.s32.totalorder %s954_s2, %s576_s14 }
  0x43   : > { %v786_v7 = vld [vmem:[#allocation2] sm:$0xff]  ;;  %v788_v8 = vld [vmem:[#allocation2 + $0x18] sm:$0xff]  ;;  %p574_p13 = pneg %p573_p12  ;;  %p579_p10 = scmp.lt.s32.totalorder %s577_s19, %s571_s11 }
  0x44   : > { %170 = vrot.lane.b32.xlu0 %v786_v7, %s643_s24  ;;  %176 = vrot.lane.b32.xlu1 %v788_v8, %s643_s24  ;;  %v794_v9 = vld [vmem:[#allocation2 + $0x8] sm:$0xff]  ;;  %v796_v10 = vld [vmem:[#allocation2 + $0x38] sm:$0xff] }
  0x45   : > { %v802_v11 = vld [vmem:[#allocation2 + $0x20] sm:$0xff]  ;;  %v807_v12 = vld [vmem:[#allocation2 + $0x30] sm:$0xff]  ;;  %p580_p0 = por %p579_p10, %p578_p8 }
  0x47   : > { %p581_p2 = pnand %p580_p0, %p574_p13 }
  0x48   : > { %172 = vrot.lane.b32.xlu0 %v794_v9, %s643_s24  ;;  %184 = vrot.lane.b32.xlu1 %v796_v10, %s643_s24 }
  0x4c   : > { %178 = vrot.lane.b32.xlu0 %v802_v11, %s643_s24  ;;  %197 = vrot.lane.b32.xlu1 %v786_v7, %s644_s16 }
  0x50   : > { %182 = vrot.lane.b32.xlu0 %v807_v12, %s643_s24  ;;  %201 = vrot.lane.b32.xlu1 %v642_v0, %s644_s16 }
  0x54   : > { %199 = vrot.lane.b32.xlu0 %v794_v9, %s644_s16  ;;  %205 = vrot.lane.b32.xlu1 %v802_v11, %s644_s16 }
  0x58   : > { %203 = vrot.lane.b32.xlu0 %v788_v8, %s644_s16  ;;  %209 = vrot.lane.b32.xlu1 %v807_v12, %s644_s16 }
  0x5c   : > { %207 = vrot.lane.b32.xlu0 %v642_v0, %s644_s16  ;;  %213 = vrot.lane.b32.xlu1 %v642_v0, %s644_s16 }
  0x60   : > { %211 = vrot.lane.b32.xlu0 %v796_v10, %s644_s16  ;;  %226 = vrot.lane.b32.xlu1 %v794_v9, %s645_s25 }
  0x64   : > { %224 = vrot.lane.b32.xlu0 %v786_v7, %s645_s25  ;;  %230 = vrot.lane.b32.xlu1 %v788_v8, %s645_s25 }
  0x68   : > { %228 = vrot.lane.b32.xlu0 %v642_v0, %s645_s25  ;;  %234 = vrot.lane.b32.xlu1 %v642_v0, %s645_s25 }
  0x6c   : > { %232 = vrot.lane.b32.xlu0 %v802_v11, %s645_s25  ;;  %238 = vrot.lane.b32.xlu1 %v796_v10, %s645_s25 }
  0x70   : > { %236 = vrot.lane.b32.xlu0 %v807_v12, %s645_s25  ;;  %251 = vrot.lane.b32.xlu1 %v786_v7, %s646_s27 }
  0x74   : > { %240 = vrot.lane.b32.xlu0 %v642_v0, %s645_s25  ;;  %255 = vrot.lane.b32.xlu1 %v642_v0, %s646_s27 }
  0x78   : > { %253 = vrot.lane.b32.xlu0 %v794_v9, %s646_s27  ;;  %259 = vrot.lane.b32.xlu1 %v802_v11, %s646_s27 }
  0x7c   : > { %257 = vrot.lane.b32.xlu0 %v788_v8, %s646_s27  ;;  %263 = vrot.lane.b32.xlu1 %v807_v12, %s646_s27 }
  0x80   : > { %261 = vrot.lane.b32.xlu0 %v642_v0, %s646_s27  ;;  %267 = vrot.lane.b32.xlu1 %v642_v0, %s646_s27 }
  0x84   : > { %265 = vrot.lane.b32.xlu0 %v796_v10, %s646_s27 }
  0xab   : > { %v175_v13 = vpop.permute.xlu1 %174  ;;  %v187_v14 = vpop.permute.xlu0 %186 }
  0xaf   : > { %v181_v15 = vpop.permute.xlu1 %180 }
  0xb6   : > { %v171_v16 = vpop.permute.xlu0 %170  ;;  %v177_v17 = vpop.permute.xlu1 %176 }
  0xb7   : > { %v188_v41 = vadd.f32 %v171_v16, %v786_v7  ;;  %v191_v50 = vadd.f32 %v177_v17, %v788_v8 }
  0xba   : > { %v173_v18 = vpop.permute.xlu0 %172  ;;  %v185_v19 = vpop.permute.xlu1 %184 }
  0xbb   : > { %v189_v43 = vadd.f32 %v173_v18, %v794_v9  ;;  %v195_v56 = vadd.f32 %v185_v19, %v796_v10 }
  0xbe   : > { %v179_v20 = vpop.permute.xlu0 %178  ;;  %v198_v21 = vpop.permute.xlu1 %197 }
  0xbf   : > { %v215_v44 = vadd.f32 %v198_v21, %v188_v41  ;;  %v192_v51 = vadd.f32 %v179_v20, %v802_v11 }
  0xc2   : > { %v183_v22 = vpop.permute.xlu0 %182  ;;  %v202_v23 = vpop.permute.xlu1 %201 }
  0xc3   : > { %v217_v47 = vadd.f32 %v202_v23, %v175_v13  ;;  %v194_v52 = vadd.f32 %v183_v22, %v807_v12 }
  0xc6   : > { %v200_v24 = vpop.permute.xlu0 %199  ;;  %v206_v25 = vpop.permute.xlu1 %205 }
  0xc7   : > { %v216_v48 = vadd.f32 %v200_v24, %v189_v43  ;;  %v219_v60 = vadd.f32 %v206_v25, %v192_v51 }
  0xca   : > { %v204_v26 = vpop.permute.xlu0 %203  ;;  %v210_v27 = vpop.permute.xlu1 %209 }
  0xcb   : > { %v218_v57 = vadd.f32 %v204_v26, %v191_v50  ;;  %v221_v61 = vadd.f32 %v210_v27, %v194_v52 }
  0xce   : > { %v208_v28 = vpop.permute.xlu0 %207  ;;  %v214_v29 = vpop.permute.xlu1 %213 }
  0xcf   : > { %v220_v0 = vadd.f32 %v208_v28, %v181_v15  ;;  %v223_v1 = vadd.f32 %v214_v29, %v187_v14 }
  0xd2   : > { %v212_v30 = vpop.permute.xlu0 %211  ;;  %v227_v31 = vpop.permute.xlu1 %226 }
  0xd3   : > { %v243_v53 = vadd.f32 %v227_v31, %v216_v48  ;;  %v222_v2 = vadd.f32 %v212_v30, %v195_v56 }
  0xd6   : > { %v225_v32 = vpop.permute.xlu0 %224  ;;  %v231_v33 = vpop.permute.xlu1 %230 }
  0xd7   : > { %v242_v49 = vadd.f32 %v225_v32, %v215_v44  ;;  %v245_v3 = vadd.f32 %v231_v33, %v218_v57 }
  0xda   : > { %v229_v34 = vpop.permute.xlu0 %228  ;;  %v235_v35 = vpop.permute.xlu1 %234 }
  0xdb   : > { %v244_v54 = vadd.f32 %v229_v34, %v217_v47  ;;  %v247_v8 = vadd.f32 %v235_v35, %v220_v0 }
  0xde   : > { %v233_v36 = vpop.permute.xlu0 %232  ;;  %v239_v37 = vpop.permute.xlu1 %238 }
  0xdf   : > { %v246_v4 = vadd.f32 %v233_v36, %v219_v60  ;;  %v856_v9 = vadd.f32 %v239_v37, %v222_v2 }
  0xe2   : > { %v237_v39 = vpop.permute.xlu0 %236  ;;  %v252_v40 = vpop.permute.xlu1 %251 }
  0xe3   : > { %v847_v55 = vadd.f32 %v252_v40, %v242_v49  ;;  %v248_v10 = vadd.f32 %v237_v39, %v221_v61 }
  0xe5   : > { %v278_v5 = vrot.slane %v847_v55, 7  ;;  %v302_v11 = vrot.slane %v847_v55, 1  ;;  %v324_v18 = vrot.slane %v847_v55, 6  ;;  %v346_v22 = vrot.slane %v847_v55, 2 }
  0xe6   : > { %v241_v45 = vpop.permute.xlu0 %240  ;;  %v256_v46 = vpop.permute.xlu1 %255 }
  0xe7   : > { %v271_v62 = vadd.f32 %v256_v46, %v244_v54  ;;  %v250_v23 = vadd.f32 %v241_v45, %v223_v1 }
  0xe9   : > { %v304_v16 = vrot.slane %v271_v62, 1  ;;  %v280_v24 = vrot.slane %v271_v62, 7  ;;  %v348_v26 = vrot.slane %v271_v62, 2  ;;  %v326_v31 = vrot.slane %v271_v62, 6 }
  0xea   : > { %v254_v58 = vpop.permute.xlu0 %253  ;;  %v260_v59 = vpop.permute.xlu1 %259 }
  0xeb   : > { %v851_v63 = vadd.f32 %v254_v58, %v243_v53  ;;  %v273_v17 = vadd.f32 %v260_v59, %v246_v4 }
  0xed   : > { %v279_v6 = vrot.slane %v851_v63, 7  ;;  %v303_v7 = vrot.slane %v851_v63, 1  ;;  %v325_v15 = vrot.slane %v851_v63, 6  ;;  %v347_v20 = vrot.slane %v851_v63, 2 }
  0xee   : > { %v258_v12 = vpop.permute.xlu0 %257  ;;  %v264_v13 = vpop.permute.xlu1 %263  ;;  %v282_v33 = vrot.slane %v273_v17, 7  ;;  %v306_v38 = vrot.slane %v273_v17, 1  ;;  %v350_v49 = vrot.slane %v273_v17, 2  ;;  %v328_v58 = vrot.slane %v273_v17, 6 }
  0xef   : > { %v294_v14 = vsel %vm289_vm2, %v278_v5, %v279_v6  ;;  %v272_v21 = vadd.f32 %v258_v12, %v245_v3  ;;  %v316_v25 = vsel %vm311_vm3, %v303_v7, %v304_v16  ;;  %v338_v32 = vsel %vm333_vm4, %v324_v18, %v325_v15 }
  0xf0   : > { %v297_v19 = vadd.f32 %v294_v14, %v851_v63  ;;  %v360_v37 = vsel %vm355_vm5, %v347_v20, %v348_v26  ;;  %v878_v43 = vadd.f32 %v264_v13, %v248_v10  ;;  %v317_v2 = vsel %vm311_vm3, %v302_v11, %v303_v7 }
  0xf1   : > { %v281_v28 = vrot.slane %v272_v21, 7  ;;  %v305_v29 = vrot.slane %v272_v21, 1  ;;  %v327_v34 = vrot.slane %v272_v21, 6  ;;  %v349_v41 = vrot.slane %v272_v21, 2 }
  0xf2   : > { %v319_v27 = vadd.f32 %v316_v25, %v297_v19  ;;  %v262_v30 = vpop.permute.xlu0 %261  ;;  %v268_v35 = vpop.permute.xlu1 %267  ;;  %v284_v0 = vrot.slane %v878_v43, 7  ;;  %v308_v16 = vrot.slane %v878_v43, 1  ;;  %v361_v15 = vsel %vm355_vm5, %v346_v22, %v347_v20 }
  0xf3   : > { %v293_v39 = vsel %vm289_vm2, %v280_v24, %v281_v28  ;;  %v274_v44 = vadd.f32 %v262_v30, %v247_v8  ;;  %v315_v46 = vsel %vm311_vm3, %v305_v29, %v306_v38  ;;  %v292_v47 = vsel %vm289_vm2, %v281_v28, %v282_v33 }
  0xf4   : > { %v341_v36 = vadd.f32 %v338_v32, %v319_v27  ;;  %v298_v40 = vadd.f32 %v293_v39, %v272_v21  ;;  %v884_v48 = vadd.f32 %v268_v35, %v250_v23  ;;  %v337_v51 = vsel %vm333_vm4, %v326_v31, %v327_v34 }
  0xf5   : > { %v307_v52 = vrot.slane %v274_v44, 1  ;;  %v283_v54 = vrot.slane %v274_v44, 7  ;;  %v299_v56 = vadd.f32 %v292_v47, %v273_v17  ;;  %v351_v61 = vrot.slane %v274_v44, 2 }
  0xf6   : > { %v363_v45 = vadd.f32 %v360_v37, %v341_v36  ;;  %v320_v50 = vadd.f32 %v315_v46, %v298_v40  ;;  %v286_v57 = vrot.slane %v884_v48, 7  ;;  %v266_v62 = vpop.permute.xlu0 %265  ;;  %v359_v63 = vsel %vm355_vm5, %v349_v41, %v350_v49 }
  0xf7   : > { %v314_v60 = vsel %vm311_vm3, %v306_v38, %v307_v52  ;;  %v336_v4 = vsel %vm333_vm4, %v327_v34, %v328_v58  ;;  %v332_v8 = vrot.slane %v884_v48, 6  ;;  %v291_v10 = vsel %vm289_vm2, %v283_v54, %v284_v0 }
  0xf8   : > { %v369_v53 = vmul.f32 0.04, %v363_v45  ;;  %v342_v59 = vadd.f32 %v337_v51, %v320_v50  ;;  %v321_v1 = vadd.f32 %v314_v60, %v299_v56  ;;  %v295_v6 = vsel %vm289_vm2, %v286_v57, %v278_v5 }
  0xf9   : > { %v296_v13 = vadd.f32 %v295_v6, %v847_v55  ;;  %v276_v7 = vadd.f32 %v266_v62, %v856_v9  ;;  %v358_v14 = vsel %vm355_vm5, %v350_v49, %v351_v61  ;;  %v300_v23 = vadd.f32 %v291_v10, %v878_v43 }
  0xfa   : > { %375 = vst.msk [vmem:[%s893_s28 + $0x8] sm:$0xff] %vm154_vm1, %v369_v53  ;;  %v364_v3 = vadd.f32 %v359_v63, %v342_v59  ;;  %v343_v12 = vadd.f32 %v336_v4, %v321_v1  ;;  %v329_v24 = vrot.slane %v274_v44, 6  ;;  %v310_v9 = vrot.slane %v884_v48, 1 }
  0xfb   : > { %v318_v17 = vadd.f32 %v317_v2, %v296_v13  ;;  %v285_v19 = vrot.slane %v276_v7, 7  ;;  %v309_v21 = vrot.slane %v276_v7, 1  ;;  %v339_v25 = vsel %vm333_vm4, %v332_v8, %v324_v18 }
  0xfc   : > { %v370_v11 = vmul.f32 0.04, %v364_v3  ;;  %v365_v5 = vadd.f32 %v358_v14, %v343_v12  ;;  %v331_v22 = vrot.slane %v276_v7, 6  ;;  %v330_v28 = vrot.slane %v878_v43, 6 }
  0xfd   : > { %v340_v27 = vadd.f32 %v339_v25, %v318_v17  ;;  %v290_v20 = vsel %vm289_vm2, %v284_v0, %v285_v19  ;;  %v313_v30 = vsel %vm311_vm3, %v308_v16, %v309_v21  ;;  %v353_v31 = vrot.slane %v276_v7, 2 }
  0xfe   : > { %376 = vst.msk [vmem:[%s893_s28 + $0x10] sm:$0xff] %vm154_vm1, %v370_v11  ;;  %v371_v26 = vmul.f32 0.04, %v365_v5  ;;  %v301_v29 = vadd.f32 %v290_v20, %v276_v7  ;;  %v312_v18 = vsel %vm311_vm3, %v309_v21, %v310_v9  ;;  %v322_v32 = vadd.f32 %v313_v30, %v300_v23 }
  0xff   : > { %v362_v55 = vadd.f32 %v361_v15, %v340_v27  ;;  %v352_v33 = vrot.slane %v878_v43, 2  ;;  %v335_v34 = vsel %vm333_vm4, %v329_v24, %v330_v28  ;;  %v354_v36 = vrot.slane %v884_v48, 2 }
 0x100   : > { %377 = vst.msk [vmem:[%s893_s28 + $0x18] sm:$0xff] %vm154_vm1, %v371_v26  ;;  %v323_v35 = vadd.f32 %v312_v18, %v301_v29  ;;  %v334_v38 = vsel %vm333_vm4, %v330_v28, %v331_v22  ;;  %v344_v39 = vadd.f32 %v335_v34, %v322_v32 }
 0x101   : > { %v368_v37 = vmul.f32 0.04, %v362_v55  ;;  %v357_v41 = vsel %vm355_vm5, %v352_v33, %v353_v31  ;;  %v356_v43 = vsel %vm355_vm5, %v353_v31, %v354_v36 }
 0x102   : > { %v345_v40 = vadd.f32 %v334_v38, %v323_v35  ;;  %v366_v44 = vadd.f32 %v357_v41, %v344_v39 }
 0x103   : > { %374 = vst.msk [vmem:[%s893_s28] sm:$0xff] %vm154_vm1, %v368_v37 }
 0x104   : > { %v367_v45 = vadd.f32 %v356_v43, %v345_v40  ;;  %v372_v46 = vmul.f32 0.04, %v366_v44 }
 0x106   : > { %v373_v47 = vmul.f32 0.04, %v367_v45  ;;  %378 = vst.msk [vmem:[%s893_s28 + $0x20] sm:$0xff] %vm154_vm1, %v372_v46 }
 0x108   : > { %379 = vst.msk [vmem:[%s893_s28 + $0x28] sm:$0xff] %vm154_vm1, %v373_v47 }
 0x109   : > { %584 = shalt.err (!%p581_p2)
}
 0x10a   : > { %s585_s20 = scalar_lea.hbm %s952_s5, 768  ;;  %s589_s26 = scalar_lea.hbm %s1003_s1, 1536 }
 0x10b   : > { %p586_p4 = scmp.ne.s32.totalorder %s952_s5, %s585_s20  ;;  %p590_p9 = scmp.lt.u32.totalorder %s952_s5, %s1003_s1 }
 0x10c   : > { %p591_p1 = scmp.lt.u32.totalorder %s589_s26, %s585_s20  ;;  %p593_p6 = scmp.lt.u32.totalorder %s585_s20, %s952_s5 }
 0x10d   : > { %p587_p5 = pnand %p586_p4, %p1009_p11 }
 0x10e   : > { %p592_p3 = por %p591_p1, %p590_p9 }
 0x10f   : > { %p588_p7 = pneg %p587_p5 }
 0x110   : > { %p594_p12 = por %p593_p6, %p592_p3 }
 0x112   : > { %p595_p13 = pnand %p594_p12, %p588_p7 }
 0x114   : > { %598 = shalt.err (!%p595_p13)
}
 0x115   : > { %s648_s16 = smov 128   ;;  %s649_s25 = smov 8  }
 0x116   : > { %488 = dma.vmem_to_hbm [thread:$0]  (%p1009_p11), %s954_s2, 768, %s952_s5, %s381_s10, %s648_s16, %s648_s16, %s649_s25  }
 0x117 PF: > { %s410_s27 = sand.u32 1, %s625_s6   ;;  %p1010_p8 = scmp.ne.s32.totalorder %s1007_s18, 0 }
 0x118   : > { %p1011_p10 = scmp.ge.s32.totalorder %s637_s9, 2  ;;  %s411_s28 = scalar_lea.sflag [#allocation5], %s410_s27 }
 0x11a   : > { %p495_p0 = pnand %p1011_p10, %p1010_p8 }
 0x11c   : > { %620 = dma.done.wait (!%p495_p0), %s411_s28, 768  }
 0x11d   : > { %622 = vsyncadd (!%p495_p0), %s411_s28, 4294966528  ;;  %p14_p2 = scmp.ge.s32.totalorder %s685_s12, 4   ;;  %s1012_s6 = smov %s629_s7 }
 0x11e   : > { %s1013_s7 = smov %s633_s8  ;;  %s1014_s8 = smov %s697_s15 }
 0x11f   : > { %s1015_s9 = smov %s685_s12  ;;  %16 = sbr.rel (!%p14_p2) target bundleno = 5 (0x5), region = 69 }
 0x126   :  { %416 = vsyncpa [#allocation4], 1 }
 0x127   :  { %418 = vsyncpa [#allocation4 + $0x1], 1 }
 0x128   :  { %419 = vsyncpa [#allocation5], 1 }
 0x129   :  { %421 = vsyncpa [#allocation5 + $0x1], 1 }

</bundles_post_ra>
